<compile_context>
chip_gen: v7x
topology: tpu7x:2x2x1
jax: 0.10.0
libtpu: 0.0.40
codegen_flags: <defaults>
</compile_context>

<pallas_src>
import jax
import jax.numpy as jnp
from jax.experimental import pallas as pl
from jax.experimental.pallas import tpu as pltpu

# ---- metadata (synthetic, small) -------------------------------------------
METADATA = {
    "encoder_input_dim": 32,
    "encoder_hidden_dim": 64,
    "generic_encoder_latent_dim": 16,
}

LANE = 128     # f32 lane width
SUBLANE = 8    # f32 sublane height


def _round_up(n, m):
    return (n + m - 1) // m * m


# ---- kernel -----------------------------------------------------------------
def encoder_kernel(
    x_ref,              # [TB, D_IN]     un-padded input tile (compute dtype)
    w1_ref, b1_ref,     # [D_IN, HP] (compute dtype), [1, HP] (f32)
    w2_ref, b2_ref,     # [HP, HP]   (compute dtype), [1, HP] (f32)
    wh_ref, bh_ref,     # [HP, OP]   (compute dtype), [1, OP] (f32)  fused mu||logvar
    out_ref,            # [TB, OP]       fused output slab (compute dtype)
):
    # Layer 1: Linear + ReLU.  MXU matmul with f32 accumulation; bias/ReLU in f32.
    h = jnp.dot(x_ref[...], w1_ref[...], preferred_element_type=jnp.float32)
    h = jnp.maximum(h + b1_ref[...], 0.0)

    # Layer 2: Linear + ReLU.  (Cast to the weight dtype only at the MXU input.)
    h = jnp.dot(h.astype(w2_ref.dtype), w2_ref[...],
                preferred_element_type=jnp.float32)
    h = jnp.maximum(h + b2_ref[...], 0.0)

    # Fused heads: [mu | logvar] in one matmul + one store (32-lane slab).
    y = jnp.dot(h.astype(wh_ref.dtype), wh_ref[...],
                preferred_element_type=jnp.float32)
    out_ref[...] = (y + bh_ref[...]).astype(out_ref.dtype)


# ---- parameter packing (hidden padded to 128 lanes, heads fused) -------------
def pack_params(p, d_in, d_hid, d_lat, *, dtype=jnp.bfloat16):
    hp = _round_up(d_hid, LANE)   # hidden padded to 128 lanes (VMEM-resident only)
    op = 2 * d_lat                # fused mu||logvar width: NO lane padding (HBM-streamed)

    def pad(a, rows, cols, dt):
        # Zero padding is essential: padded rows/cols must not leak into outputs.
        out = jnp.zeros((rows, cols), dt)
        return out.at[: a.shape[0], : a.shape[1]].set(a.astype(dt))

    wh = jnp.concatenate([p["wmu"], p["wlv"]], axis=1)   # [H, 2L]
    bh = jnp.concatenate([p["bmu"], p["blv"]], axis=1)   # [1, 2L]

    return dict(
        # weights in the streamed/compute dtype; biases stay f32 (adds are f32)
        w1=pad(p["w1"], d_in, hp, dtype), b1=pad(p["b1"], 1, hp, jnp.float32),
        w2=pad(p["w2"], hp, hp, dtype),   b2=pad(p["b2"], 1, hp, jnp.float32),
        wh=pad(wh, hp, op, dtype),        bh=pad(bh, 1, op, jnp.float32),
        d_in=d_in, hp=hp, op=op, d_lat=d_lat, dtype=dtype,
    )


# ---- wrapper ----------------------------------------------------------------
def generic_encoder_forward(x, packed, *, tb=None):
    """x: [batch, encoder_input_dim]. Returns (mu, logvar): [batch, latent] each."""
    B, d_in = x.shape
    assert d_in == packed["d_in"]
    hp, op, d_lat = packed["hp"], packed["op"], packed["d_lat"]
    dtype = packed["dtype"]

    # Batch tile: ~ceil(B/2) so v7x's two TensorCores both get a grid step when
    # B is large; cap at 2048 (double-buffered x/out + resident weights + the
    # f32 intermediate stay ~2 MiB, far inside v5e/v6e/v7x scoped-VMEM defaults).
    if tb is None:
        tb = min(2048, _round_up(pl.cdiv(max(B, 1), 2), SUBLANE))
    tb = max(SUBLANE, _round_up(tb, SUBLANE))
    bp = _round_up(max(B, 1), tb)

    # Only the batch dimension is padded; no feature-padding pass through HBM.
    xc = x.astype(dtype)
    if bp != B:
        xc = jnp.pad(xc, ((0, bp - B), (0, 0)))

    const = lambda i: (0, 0)   # weights/biases: single block, resident in VMEM
    itemsize = jnp.dtype(dtype).itemsize
    weight_bytes = (d_in * hp + hp * hp + hp * op) * itemsize + (2 * hp + op) * 4
    cost = pl.CostEstimate(
        flops=2 * bp * (d_in * hp + hp * hp + hp * op),
        transcendentals=0,
        bytes_accessed=bp * (d_in + op) * itemsize + weight_bytes,
    )

    out = pl.pallas_call(
        encoder_kernel,
        out_shape=jax.ShapeDtypeStruct((bp, op), dtype),
        grid=(bp // tb,),
        in_specs=[
            pl.BlockSpec((tb, d_in), lambda i: (i, 0)),   # x: blocked batch, un-padded lanes
            pl.BlockSpec((d_in, hp), const),              # w1
            pl.BlockSpec((1, hp), const),                 # b1 (f32)
            pl.BlockSpec((hp, hp), const),                # w2
            pl.BlockSpec((1, hp), const),                 # b2 (f32)
            pl.BlockSpec((hp, op), const),                # fused head weight
            pl.BlockSpec((1, op), const),                 # fused head bias (f32)
        ],
        out_specs=pl.BlockSpec((tb, op), lambda i: (i, 0)),
        compiler_params=pltpu.CompilerParams(
            # Batch axis is independent -> shard across v7x's two TensorCores.
            dimension_semantics=("parallel",),
        ),
        cost_estimate=cost,
    )(xc, packed["w1"], packed["b1"], packed["w2"], packed["b2"],
      packed["wh"], packed["bh"])

    # Free XLA slices: drop batch padding and split fused heads.
    mu = out[:B, :d_lat]
    logvar = out[:B, d_lat:op]
    return mu, logvar


# ---- deterministic parameter initialization ---------------------------------
def init_params(key, d_in, d_hid, d_lat):
    ks = jax.random.split(key, 8)

    def linear(kw, kb, fan_in, fan_out):
        # Kaiming-uniform-ish deterministic init (matches nn.Linear's bound).
        bound = 1.0 / jnp.sqrt(fan_in)
        w = jax.random.uniform(kw, (fan_in, fan_out), jnp.float32, -bound, bound)
        b = jax.random.uniform(kb, (1, fan_out), jnp.float32, -bound, bound)
        return w, b

    w1, b1 = linear(ks[0], ks[1], d_in, d_hid)
    w2, b2 = linear(ks[2], ks[3], d_hid, d_hid)
    wmu, bmu = linear(ks[4], ks[5], d_hid, d_lat)
    wlv, blv = linear(ks[6], ks[7], d_hid, d_lat)
    return dict(w1=w1, b1=b1, w2=w2, b2=b2, wmu=wmu, bmu=bmu, wlv=wlv, blv=blv)


# ---- reference (pure JAX) for sanity check -----------------------------------
def reference_forward(x, p):
    h = jnp.maximum(x @ p["w1"] + p["b1"], 0.0)
    h = jnp.maximum(h @ p["w2"] + p["b2"], 0.0)
    return h @ p["wmu"] + p["bmu"], h @ p["wlv"] + p["blv"]


if __name__ == "__main__":
    d_in = METADATA["encoder_input_dim"]
    d_hid = METADATA["encoder_hidden_dim"]
    d_lat = METADATA["generic_encoder_latent_dim"]

    key = jax.random.PRNGKey(0)
    kx, kp, kx2 = jax.random.split(key, 3)
    params = init_params(kp, d_in, d_hid, d_lat)

    # --- f32 packing: exact correctness check ---------------------------------
    packed_f32 = pack_params(params, d_in, d_hid, d_lat, dtype=jnp.float32)

    batch = 8
    x = jax.random.normal(kx, (batch, d_in), jnp.float32)
    mu, logvar = generic_encoder_forward(x, packed_f32)
    jax.block_until_ready((mu, logvar))
    mu_ref, lv_ref = reference_forward(x, params)
    assert mu.shape == (batch, d_lat) and logvar.shape == (batch, d_lat)
    assert jnp.allclose(mu, mu_ref, atol=1e-5, rtol=1e-5)
    assert jnp.allclose(logvar, lv_ref, atol=1e-5, rtol=1e-5)

    # Ragged batch + multi-step grid (exercises batch padding + pipeline).
    batch2 = 200
    x2 = jax.random.normal(kx2, (batch2, d_in), jnp.float32)
    mu2, lv2 = generic_encoder_forward(x2, packed_f32, tb=64)
    jax.block_until_ready((mu2, lv2))
    mu2_ref, lv2_ref = reference_forward(x2, params)
    assert mu2.shape == (batch2, d_lat) and lv2.shape == (batch2, d_lat)
    assert jnp.allclose(mu2, mu2_ref, atol=1e-5, rtol=1e-5)
    assert jnp.allclose(lv2, lv2_ref, atol=1e-5, rtol=1e-5)

    # --- bf16 streaming packing (default perf mode): loose tolerance ----------
    packed_bf16 = pack_params(params, d_in, d_hid, d_lat, dtype=jnp.bfloat16)
    mu3, lv3 = generic_encoder_forward(x2, packed_bf16)   # default tb -> 2 grid steps
    jax.block_until_ready((mu3, lv3))
    assert mu3.shape == (batch2, d_lat) and lv3.shape == (batch2, d_lat)
    assert jnp.allclose(mu3.astype(jnp.float32), mu2_ref, atol=5e-2, rtol=5e-2)
    assert jnp.allclose(lv3.astype(jnp.float32), lv2_ref, atol=5e-2, rtol=5e-2)

    print("KERNEL_OK")
</pallas_src>

<mosaic_0001>
module attributes {stable_mosaic.version = 11 : i64} {
  func.func @encoder_kernel(%arg0: i32, %arg1: memref<8x32xf32, #tpu.memory_space<vmem>>, %arg2: memref<32x128xf32, #tpu.memory_space<vmem>>, %arg3: memref<1x128xf32, #tpu.memory_space<vmem>>, %arg4: memref<128x128xf32, #tpu.memory_space<vmem>>, %arg5: memref<1x128xf32, #tpu.memory_space<vmem>>, %arg6: memref<128x32xf32, #tpu.memory_space<vmem>>, %arg7: memref<1x32xf32, #tpu.memory_space<vmem>>, %arg8: memref<8x32xf32, #tpu.memory_space<vmem>>) attributes {dimension_semantics = [#tpu.dimension_semantics<parallel>], iteration_bounds = array<i64: 1>, scalar_prefetch = 0 : i64, scratch_operands = 0 : i64, tpu.core_type = #tpu.core_type<tc>, window_params = [{transform_indices = @transform_0, window_bounds = array<i64: 8, 32>}, {pipeline_mode = #tpu.pipeline_mode<synchronous>, transform_indices = @transform_1, window_bounds = array<i64: 32, 128>}, {pipeline_mode = #tpu.pipeline_mode<synchronous>, transform_indices = @transform_2, window_bounds = array<i64: 1, 128>}, {pipeline_mode = #tpu.pipeline_mode<synchronous>, transform_indices = @transform_3, window_bounds = array<i64: 128, 128>}, {pipeline_mode = #tpu.pipeline_mode<synchronous>, transform_indices = @transform_4, window_bounds = array<i64: 1, 128>}, {pipeline_mode = #tpu.pipeline_mode<synchronous>, transform_indices = @transform_5, window_bounds = array<i64: 128, 32>}, {pipeline_mode = #tpu.pipeline_mode<synchronous>, transform_indices = @transform_6, window_bounds = array<i64: 1, 32>}, {transform_indices = @transform_7, window_bounds = array<i64: 8, 32>}]} {
    %c0 = arith.constant 0 : index
    %c0_0 = arith.constant 0 : index
    %0 = vector.load %arg1[%c0, %c0_0] : memref<8x32xf32, #tpu.memory_space<vmem>>, vector<8x32xf32>
    %c0_1 = arith.constant 0 : index
    %c0_2 = arith.constant 0 : index
    %1 = vector.load %arg2[%c0_1, %c0_2] : memref<32x128xf32, #tpu.memory_space<vmem>>, vector<32x128xf32>
    %cst = arith.constant dense<0.000000e+00> : vector<8x128xf32>
    %2 = tpu.matmul %0, %1, %cst {dimension_numbers = #tpu.dot_dimension_numbers<[1], [0], [0], [1], [0, 0, 1, 1], [], []>} : vector<8x32xf32>, vector<32x128xf32>, vector<8x128xf32> -> vector<8x128xf32>
    %c0_3 = arith.constant 0 : index
    %c0_4 = arith.constant 0 : index
    %3 = vector.load %arg3[%c0_3, %c0_4] : memref<1x128xf32, #tpu.memory_space<vmem>>, vector<1x128xf32>
    %4 = vector.broadcast %3 : vector<1x128xf32> to vector<8x128xf32>
    %5 = arith.addf %2, %4 : vector<8x128xf32>
    %cst_5 = arith.constant 0.000000e+00 : f32
    %6 = vector.broadcast %cst_5 : f32 to vector<8x128xf32>
    %7 = arith.maximumf %5, %6 : vector<8x128xf32>
    %c0_6 = arith.constant 0 : index
    %c0_7 = arith.constant 0 : index
    %8 = vector.load %arg4[%c0_6, %c0_7] : memref<128x128xf32, #tpu.memory_space<vmem>>, vector<128x128xf32>
    %cst_8 = arith.constant dense<0.000000e+00> : vector<8x128xf32>
    %9 = tpu.matmul %7, %8, %cst_8 {dimension_numbers = #tpu.dot_dimension_numbers<[1], [0], [0], [1], [0, 0, 1, 1], [], []>} : vector<8x128xf32>, vector<128x128xf32>, vector<8x128xf32> -> vector<8x128xf32>
    %c0_9 = arith.constant 0 : index
    %c0_10 = arith.constant 0 : index
    %10 = vector.load %arg5[%c0_9, %c0_10] : memref<1x128xf32, #tpu.memory_space<vmem>>, vector<1x128xf32>
    %11 = vector.broadcast %10 : vector<1x128xf32> to vector<8x128xf32>
    %12 = arith.addf %9, %11 : vector<8x128xf32>
    %cst_11 = arith.constant 0.000000e+00 : f32
    %13 = vector.broadcast %cst_11 : f32 to vector<8x128xf32>
    %14 = arith.maximumf %12, %13 : vector<8x128xf32>
    %c0_12 = arith.constant 0 : index
    %c0_13 = arith.constant 0 : index
    %15 = vector.load %arg6[%c0_12, %c0_13] : memref<128x32xf32, #tpu.memory_space<vmem>>, vector<128x32xf32>
    %cst_14 = arith.constant dense<0.000000e+00> : vector<8x32xf32>
    %16 = tpu.matmul %14, %15, %cst_14 {dimension_numbers = #tpu.dot_dimension_numbers<[1], [0], [0], [1], [0, 0, 1, 1], [], []>} : vector<8x128xf32>, vector<128x32xf32>, vector<8x32xf32> -> vector<8x32xf32>
    %c0_15 = arith.constant 0 : index
    %c0_16 = arith.constant 0 : index
    %17 = vector.load %arg7[%c0_15, %c0_16] : memref<1x32xf32, #tpu.memory_space<vmem>>, vector<1x32xf32>
    %18 = vector.broadcast %17 : vector<1x32xf32> to vector<8x32xf32>
    %19 = arith.addf %16, %18 : vector<8x32xf32>
    %c0_17 = arith.constant 0 : index
    %c0_18 = arith.constant 0 : index
    %20 = vector.load %arg8[%c0_17, %c0_18] : memref<8x32xf32, #tpu.memory_space<vmem>>, vector<8x32xf32>
    tpu.vector_store %arg8[%c0_17, %c0_18], %19 {strides = array<i32>} : memref<8x32xf32, #tpu.memory_space<vmem>>, vector<8x32xf32>,
    return
  }
  func.func @transform_0(%arg0: i32) -> (i32, i32) {
    %c0_i32 = arith.constant 0 : i32
    %c0_i32_0 = arith.constant 0 : i32
    return %arg0, %c0_i32 : i32, i32
  }
  func.func @transform_1(%arg0: i32) -> (i32, i32) {
    %c0_i32 = arith.constant 0 : i32
    %c0_i32_0 = arith.constant 0 : i32
    %c0_i32_1 = arith.constant 0 : i32
    return %c0_i32, %c0_i32_0 : i32, i32
  }
  func.func @transform_2(%arg0: i32) -> (i32, i32) {
    %c0_i32 = arith.constant 0 : i32
    %c0_i32_0 = arith.constant 0 : i32
    %c0_i32_1 = arith.constant 0 : i32
    return %c0_i32, %c0_i32_0 : i32, i32
  }
  func.func @transform_3(%arg0: i32) -> (i32, i32) {
    %c0_i32 = arith.constant 0 : i32
    %c0_i32_0 = arith.constant 0 : i32
    %c0_i32_1 = arith.constant 0 : i32
    return %c0_i32, %c0_i32_0 : i32, i32
  }
  func.func @transform_4(%arg0: i32) -> (i32, i32) {
    %c0_i32 = arith.constant 0 : i32
    %c0_i32_0 = arith.constant 0 : i32
    %c0_i32_1 = arith.constant 0 : i32
    return %c0_i32, %c0_i32_0 : i32, i32
  }
  func.func @transform_5(%arg0: i32) -> (i32, i32) {
    %c0_i32 = arith.constant 0 : i32
    %c0_i32_0 = arith.constant 0 : i32
    %c0_i32_1 = arith.constant 0 : i32
    return %c0_i32, %c0_i32_0 : i32, i32
  }
  func.func @transform_6(%arg0: i32) -> (i32, i32) {
    %c0_i32 = arith.constant 0 : i32
    %c0_i32_0 = arith.constant 0 : i32
    %c0_i32_1 = arith.constant 0 : i32
    return %c0_i32, %c0_i32_0 : i32, i32
  }
  func.func @transform_7(%arg0: i32) -> (i32, i32) {
    %c0_i32 = arith.constant 0 : i32
    %c0_i32_0 = arith.constant 0 : i32
    return %arg0, %c0_i32 : i32, i32
  }
}

</mosaic_0001>

<bundles_post_ra>
// kernel: tpu_custom_call.1
= control target key start
LH: loop header
LB: loop body
LE: loop exit
PB: predicated region body
PF: predicated region fallthrough
CT: control target
= control target key end

     0   :  { %v522_v3 = vmov 0.0|0.0   ;;  %vm523_vm0 = vmmov 0   ;;  %v524_v6 = vmov 0.0   ;;  %s721_s0 = inlined_call_operand.vmem [shape: f32[8,32], index: 0, kind: input, shape index: {}]   ;;  %s722_s1 = inlined_call_operand.vmem [shape: f32[32,128], index: 1, kind: input, shape index: {}]   ;;  %s723_s2 = inlined_call_operand.vmem [shape: f32[1,128], index: 2, kind: input, shape index: {}]   ;;  %s724_s3 = inlined_call_operand.vmem [shape: f32[128,128], index: 3, kind: input, shape index: {}]   ;;  %s725_s4 = inlined_call_operand.vmem [shape: f32[1,128], index: 4, kind: input, shape index: {}]   ;;  %s726_s5 = inlined_call_operand.vmem [shape: f32[128,32], index: 5, kind: input, shape index: {}]   ;;  %s727_s6 = inlined_call_operand.vmem [shape: f32[1,32], index: 6, kind: input, shape index: {}]   ;;  %s728_s7 = inlined_call_operand.hbm [shape: f32[8,32], index: 7, kind: output, shape index: {}]  }
   0x1   :  { %v28_v0 = vld [vmem:[%s722_s1] sm:$0xff]  ;;  %v29_v1 = vld [vmem:[%s722_s1 + $0x8] sm:$0xff]  ;;  %v30_v2 = vld [vmem:[%s722_s1 + $0x10] sm:$0xff]  ;;  %440 = vmatprep.subr.bf16.mxu0 %v522_v3  ;;  %367 = vmatprep.mubr.msk.f32.mxu0 %vm523_vm0, %v524_v6 }
   0x2   :  { %v441_v4 = vpack.c.bf16 %v29_v1, %v28_v0  ;;  %v31_v5 = vld [vmem:[%s722_s1 + $0x18] sm:$0xff]  ;;  %v114_v7 = vld [vmem:[%s724_s3] sm:$0xff]  ;;  %446 = vmatprep.subr.bf16.mxu1 %v522_v3  ;;  %v115_v8 = vld [vmem:[%s724_s3 + $0x8] sm:$0xff]  ;;  %402 = vmatprep.mubr.msk.f32.mxu1 %vm523_vm0, %v524_v6 }
   0x3   :  { %v116_v9 = vld [vmem:[%s724_s3 + $0x10] sm:$0xff]  ;;  %v117_v10 = vld [vmem:[%s724_s3 + $0x18] sm:$0xff]  ;;  %v444_v11 = vpack.c.bf16 %v31_v5, %v30_v2  ;;  %v447_v12 = vpack.c.bf16 %v115_v8, %v114_v7  ;;  %v118_v14 = vld [vmem:[%s724_s3 + $0x20] sm:$0xff] }
   0x4   :  { %442 = vmatpush3.bf16.msra.mxu0 %v441_v4  ;;  %v450_v13 = vpack.c.bf16 %v117_v10, %v116_v9  ;;  %v119_v15 = vld [vmem:[%s724_s3 + $0x28] sm:$0xff] }
   0x5   :  { %443 = vmatprep.subr.bf16.mxu0 %v522_v3  ;;  %448 = vmatpush3.bf16.msra.mxu1 %v447_v12 }
   0x6   :  { %449 = vmatprep.subr.bf16.mxu1 %v522_v3 }
   0x7   :  { %12 = vsyncpa [#allocation3], 0  ;;  %v27_v16 = vld [vmem:[%s721_s0] sm:$0xff]  ;;  %vm39_vm1 = vcmask 261120   ;;  %v453_v17 = vpack.c.bf16 %v119_v15, %v118_v14  ;;  %v120_v18 = vld [vmem:[%s724_s3 + $0x30] sm:$0xff]  ;;  %s525_s26 = smov [#allocation2]  }
   0x8   :  { %445 = vmatpush3.bf16.msra.mxu0 %v444_v11  ;;  %v121_v19 = vld [vmem:[%s724_s3 + $0x38] sm:$0xff]  ;;  %v122_v21 = vld [vmem:[%s724_s3 + $0x40] sm:$0xff]  ;;  %v123_v22 = vld [vmem:[%s724_s3 + $0x48] sm:$0xff]  ;;  %s308_s27 = sshll.u32 %s525_s26, 4  ;;  %s309_s27 = int_to_ptr.vmem [resolvable:$true] %s308_s27 }
   0x9   :  { %470 = vmatprep.subr.bf16.mxu0 %v522_v3  ;;  %451 = vmatpush3.bf16.msra.mxu1 %v450_v13  ;;  %v456_v20 = vpack.c.bf16 %v121_v19, %v120_v18  ;;  %v459_v23 = vpack.c.bf16 %v123_v22, %v122_v21  ;;  %v124_v24 = vld [vmem:[%s724_s3 + $0x50] sm:$0xff]  ;;  %v125_v25 = vld [vmem:[%s724_s3 + $0x58] sm:$0xff]  ;;  %v126_v27 = vld [vmem:[%s724_s3 + $0x60] sm:$0xff]  ;;  %p503_p1 = scmp.lt.s32.totalorder %s309_s27, %s309_s27 }
   0xa   :  { %452 = vmatprep.subr.bf16.mxu1 %v522_v3  ;;  %v462_v26 = vpack.c.bf16 %v125_v25, %v124_v24  ;;  %v127_v28 = vld [vmem:[%s724_s3 + $0x68] sm:$0xff]  ;;  %v128_v30 = vld [vmem:[%s724_s3 + $0x70] sm:$0xff]  ;;  %v129_v31 = vld [vmem:[%s724_s3 + $0x78] sm:$0xff] }
   0xb   :  { %368 = vmatmul.mubr.msk.f32.vlgmr.msra.gmra.mrb[0].mxu0 %vm39_vm1, %v27_v16  ;;  %v465_v29 = vpack.c.bf16 %v127_v28, %v126_v27  ;;  %v468_v32 = vpack.c.bf16 %v129_v31, %v128_v30  ;;  %v208_v33 = vld [vmem:[%s726_s5] sm:$0xff]  ;;  %v209_v34 = vld [vmem:[%s726_s5 + $0x8] sm:$0xff]  ;;  %v210_v35 = vld [vmem:[%s726_s5 + $0x10] sm:$0xff] }
   0xc   :  { %437 = vmatprep.mubr.msk.f32.mxu0 %vm523_vm0, %v524_v6  ;;  %v471_v36 = vpack.c.bf16 %v209_v34, %v208_v33  ;;  %v211_v37 = vld [vmem:[%s726_s5 + $0x18] sm:$0xff]  ;;  %v212_v39 = vld [vmem:[%s726_s5 + $0x20] sm:$0xff]  ;;  %v213_v40 = vld [vmem:[%s726_s5 + $0x28] sm:$0xff] }
   0xd   :  { %454 = vmatpush3.bf16.msra.mxu1 %v453_v17  ;;  %v474_v38 = vpack.c.bf16 %v211_v37, %v210_v35  ;;  %v477_v41 = vpack.c.bf16 %v213_v40, %v212_v39  ;;  %v214_v42 = vld [vmem:[%s726_s5 + $0x30] sm:$0xff]  ;;  %v215_v43 = vld [vmem:[%s726_s5 + $0x38] sm:$0xff]  ;;  %v216_v45 = vld [vmem:[%s726_s5 + $0x40] sm:$0xff] }
   0xe   :  { %455 = vmatprep.subr.bf16.mxu1 %v522_v3  ;;  %472 = vmatpush3.bf16.msra.mxu0 %v471_v36  ;;  %v480_v44 = vpack.c.bf16 %v215_v43, %v214_v42  ;;  %v217_v46 = vld [vmem:[%s726_s5 + $0x48] sm:$0xff]  ;;  %v218_v48 = vld [vmem:[%s726_s5 + $0x50] sm:$0xff]  ;;  %v219_v49 = vld [vmem:[%s726_s5 + $0x58] sm:$0xff] }
   0xf   :  { %473 = vmatprep.subr.bf16.mxu0 %v522_v3  ;;  %v483_v47 = vpack.c.bf16 %v217_v46, %v216_v45  ;;  %v486_v50 = vpack.c.bf16 %v219_v49, %v218_v48  ;;  %v220_v51 = vld [vmem:[%s726_s5 + $0x60] sm:$0xff]  ;;  %v221_v52 = vld [vmem:[%s726_s5 + $0x68] sm:$0xff]  ;;  %v222_v59 = vld [vmem:[%s726_s5 + $0x70] sm:$0xff] }
  0x10   :  { %v489_v53 = vpack.c.bf16 %v221_v52, %v220_v51  ;;  %v316_v54 = vld [vmem:[%s723_s2] ss:$0 sm:$0xff]  ;;  %v223_v60 = vld [vmem:[%s726_s5 + $0x78] sm:$0xff]  ;;  %s498_s5 = scalar_lea.vmem %s309_s27, 128 }
  0x11   :  { %457 = vmatpush3.bf16.msra.mxu1 %v456_v20  ;;  %v492_v61 = vpack.c.bf16 %v223_v60, %v222_v59  ;;  %v318_v62 = vld [vmem:[%s725_s4] ss:$0 sm:$0xff]  ;;  %p499_p0 = scmp.ne.s32.totalorder %s309_s27, %s498_s5  ;;  %p504_p2 = scmp.lt.s32.totalorder %s498_s5, %s498_s5 }
  0x12   :  { %458 = vmatprep.subr.bf16.mxu1 %v522_v3  ;;  %475 = vmatpush3.bf16.msra.mxu0 %v474_v38 }
  0x13   :  { %476 = vmatprep.subr.bf16.mxu0 %v522_v3  ;;  %p505_p3 = por %p504_p2, %p503_p1 }
  0x15   :  { %460 = vmatpush3.bf16.msra.mxu1 %v459_v23  ;;  %p506_p4 = pnand %p505_p3, %p499_p0 }
  0x16   :  { %461 = vmatprep.subr.bf16.mxu1 %v522_v3  ;;  %478 = vmatpush3.bf16.msra.mxu0 %v477_v41 }
  0x17   :  { %479 = vmatprep.subr.bf16.mxu0 %v522_v3 }
  0x19   :  { %463 = vmatpush3.bf16.msra.mxu1 %v462_v26 }
  0x1a   :  { %464 = vmatprep.subr.bf16.mxu1 %v522_v3  ;;  %481 = vmatpush3.bf16.msra.mxu0 %v480_v44 }
  0x1b   :  { %482 = vmatprep.subr.bf16.mxu0 %v522_v3 }
  0x1d   :  { %466 = vmatpush3.bf16.msra.mxu1 %v465_v29 }
  0x1e   :  { %467 = vmatprep.subr.bf16.mxu1 %v522_v3  ;;  %484 = vmatpush3.bf16.msra.mxu0 %v483_v47 }
  0x1f   :  { %485 = vmatprep.subr.bf16.mxu0 %v522_v3 }
  0x21   :  { %469 = vmatpush3.bf16.msra.mxu1 %v468_v32 }
  0x22   :  { %487 = vmatpush3.bf16.msra.mxu0 %v486_v50 }
  0x23   :  { %488 = vmatprep.subr.bf16.mxu0 %v522_v3 }
  0x26   :  { %490 = vmatpush3.bf16.msra.mxu0 %v489_v53 }
  0x27   :  { %491 = vmatprep.subr.bf16.mxu0 %v522_v3  ;;  %v319_v3 = vld [vmem:[%s727_s6] ss:$0 sm:$0xff] }
  0x2a   :  { %493 = vmatpush3.bf16.msra.mxu0 %v492_v61 }
  0xde   :  { %v109_v55 = vpop.f32.mrb[0].mxu0 }
  0xdf   :  { %v110_v56 = vadd.f32 %v316_v54, %v109_v55  ;;  %v369_v57 = vpop.f32.mrb[1].mxu0 }
  0xe1   :  { %v113_v58 = vmax.f32 %v110_v56, 0.0 }
  0xe3   :  { %403 = vmatmul.mubr.f32.vlgmr.msra.gmra.mrb[0].mxu1 %v113_v58 }
 0x1b6   :  { %v203_v63 = vpop.f32.mrb[0].mxu1 }
 0x1b7   :  { %v204_v0 = vadd.f32 %v318_v62, %v203_v63  ;;  %v404_v1 = vpop.f32.mrb[1].mxu1 }
 0x1b9   :  { %v207_v2 = vmax.f32 %v204_v0, 0.0 }
 0x1bb   :  { %438 = vmatmul.mubr.f32.vlgmr.msra.gmra.mrb[2].mxu0 %v207_v2 }
 0x28e   :  { %v297_v4 = vpop.f32.mrb[2].mxu0 }
 0x28f   :  { %v298_v5 = vadd.f32 %v319_v3, %v297_v4  ;;  %v439_v6 = vpop.f32.mrb[3].mxu0 }
 0x291   :  { %301 = vst.msk [vmem:[#allocation2] sm:$0xff] %vm39_vm1, %v298_v5 }
 0x292   :  { %509 = shalt.err (!%p506_p4)
}
 0x293   :  { %s510_s29 = scalar_lea.hbm %s728_s7, 128 }
 0x294   :  { %p511_p5 = scmp.ne.s32.totalorder %s728_s7, %s510_s29  ;;  %p514_p6 = scmp.lt.u32.totalorder %s510_s29, %s728_s7 }
 0x296   :  { %p516_p7 = pnand %p514_p6, %p511_p5 }
 0x298   :  { %519 = shalt.err (!%p516_p7)
}
 0x299   :  { %311 = dma.vmem_to_hbm [thread:$0]  %s309_s27, 128, %s728_s7, [#allocation3]  }
 0x29a   :  { %520 = dma.done.wait [#allocation3], 128  }
 0x29b   :  { %521 = vsyncadd [#allocation3], 4294967168 }
 0x29c   :  { %315 = vsyncpa [#allocation3], 1 }

</bundles_post_ra>
